<compile_context>
chip_gen: v6e
topology: v6e:2x2x1
jax: 0.10.0
libtpu: 0.0.40
codegen_flags: <defaults>
</compile_context>

<pallas_src>
import jax
import jax.numpy as jnp
from jax import lax
from jax.experimental import pallas as pl
from jax.experimental.pallas import tpu as pltpu

_M_PAD = 8  # sublane-padded number of classes (real number of classes = 2)


def _round_up(x: int, m: int) -> int:
    return (x + m - 1) // m * m


def _vmem_capacity_bytes() -> int:
    try:
        return int(pltpu.get_tpu_info().vmem_capacity_bytes)
    except Exception:
        return 64 << 20  # conservative fallback (v7x per-TensorCore VMEM)


def nsp_linear_kernel(x_ref, w_ref, b_ref, o_ref):
    # x_ref: (TB, H)   w_ref: (8, H)   b_ref: (8, 1)   o_ref: (8, TB)
    # logits_t[c, b] = sum_h W[c, h] * x[b, h]  (contract H of both operands;
    # MXU "A @ B^T" mode -- no explicit transpose of the x tile).
    logits_t = lax.dot_general(
        w_ref[...], x_ref[...],
        dimension_numbers=(((1,), (1,)), ((), ())),
        preferred_element_type=jnp.float32,
    )
    o_ref[...] = (logits_t + b_ref[...]).astype(o_ref.dtype)


def prepare_nsp_params(weight, bias, param_dtype=None):
    """Pad (2, H) weight -> (8, H) and (2,) bias -> (8, 1) ONCE, outside the
    per-call hot path (avoids an extra pad/transpose dispatch every forward)."""
    n_cls, H = weight.shape
    dt = param_dtype if param_dtype is not None else weight.dtype
    w_pad = jnp.zeros((_M_PAD, H), dtype=dt).at[:n_cls, :].set(weight.astype(dt))
    b_pad = jnp.zeros((_M_PAD, 1), dtype=jnp.float32).at[:n_cls, 0].set(
        bias.astype(jnp.float32))
    return w_pad, b_pad


def next_sentence_prediction(pooled_output, weight, bias, *,
                             tile_b=None, n_classes: int = 2):
    """pooled_output: (B, H); weight: (2, H) or pre-padded (8, H);
    bias: (2,) or pre-padded (8, 1)  ->  logits (B, 2) f32.

    Pass pooled_output in bf16 (produced upstream) to halve HBM read traffic;
    accumulation stays f32 via preferred_element_type."""
    B, H = pooled_output.shape
    x = pooled_output
    in_dtype = x.dtype
    itemsize = jnp.dtype(in_dtype).itemsize

    # Accept raw or pre-padded parameters.
    if weight.ndim == 2 and weight.shape[0] == _M_PAD and bias.ndim == 2:
        w_pad, b_pad = weight, bias
    else:
        w_pad, b_pad = prepare_nsp_params(weight, bias)
    if w_pad.dtype != in_dtype:
        w_pad = w_pad.astype(in_dtype)  # tiny (8, H) cast

    # ---- generation-aware tile choice & exact VMEM budget -------------------
    cap = _vmem_capacity_bytes()
    budget = int(cap * 0.6)                       # headroom for Mosaic scratch
    per_row = 2 * H * itemsize + 2 * _M_PAD * 4   # x dbuf + out dbuf per batch row
    fixed = 2 * _M_PAD * H * itemsize + 2 * _M_PAD * 128 * 4  # weight + bias (2x)
    tb_budget = max(128, ((budget - fixed) // max(per_row, 1)) // 128 * 128)
    if tile_b is None:
        # v5e/v6e (128 MiB VMEM) take bigger tiles than v7x (64 MiB).
        tile_b = 8192 if cap >= (96 << 20) else 4096
    TB = max(128, _round_up(min(tile_b, tb_budget), 128))

    B_lane = _round_up(B, 128)                    # batch sits on the lane axis
    TB = min(TB, B_lane)
    # Keep >= 2 grid steps when the batch allows so dimension_semantics
    # ("parallel",) can shard tiles across v7x's two TensorCores.
    if B_lane >= 256:
        TB = min(TB, _round_up(B_lane // 2, 128))
    TB = max(128, TB)
    B_pad = _round_up(B_lane, TB)
    if B_pad != B:
        x = jnp.pad(x, ((0, B_pad - B), (0, 0)))
    grid = (B_pad // TB,)

    vmem_needed = (2 * TB * H * itemsize          # x double buffer
                   + 2 * _M_PAD * TB * 4          # output double buffer (f32)
                   + 2 * _M_PAD * H * itemsize    # resident weight (worst case 2x)
                   + 2 * _M_PAD * 128 * 4)        # bias tile (padded, worst case 2x)
    vmem_limit = int(min(max(int(vmem_needed * 1.5), 16 << 20), cap - (8 << 20)))
    assert vmem_needed <= vmem_limit, (
        f"tile does not fit VMEM budget: need {vmem_needed} > limit {vmem_limit}")

    out_t = pl.pallas_call(
        nsp_linear_kernel,
        out_shape=jax.ShapeDtypeStruct((_M_PAD, B_pad), jnp.float32),
        grid_spec=pltpu.PrefetchScalarGridSpec(
            num_scalar_prefetch=0,
            grid=grid,
            in_specs=[
                pl.BlockSpec((TB, H), lambda i: (i, 0)),       # streamed x tiles
                pl.BlockSpec((_M_PAD, H), lambda i: (0, 0)),   # resident weight
                pl.BlockSpec((_M_PAD, 1), lambda i: (0, 0)),   # resident bias
            ],
            out_specs=pl.BlockSpec((_M_PAD, TB), lambda i: (0, i)),
        ),
        compiler_params=pltpu.CompilerParams(
            dimension_semantics=("parallel",),   # independent batch tiles
            vmem_limit_bytes=vmem_limit,
        ),
    )(x, w_pad, b_pad)

    # Tiny (n_classes, B) slice + transpose -- 16x less data than the previous
    # (B_pad, 128)-wide padded output round trip.
    return out_t[:n_classes, :B].T


if __name__ == "__main__":
    # Small config consistent with the module: batch=8, hidden_size=32.
    batch = 8
    hidden_size = 32
    initializer_range = 0.02

    key = jax.random.PRNGKey(0)
    k_x, k_w = jax.random.split(key)

    # Deterministic parameter init mirroring the PyTorch __init__:
    #   weight = fmod(randn(2, hidden), initializer_range); bias = zeros(2)
    weight = jnp.fmod(
        jax.random.normal(k_w, (2, hidden_size), dtype=jnp.float32),
        initializer_range,
    )
    bias = jnp.zeros((2,), dtype=jnp.float32)

    pooled_output = jax.random.normal(k_x, (batch, hidden_size), dtype=jnp.float32)

    # Hoist parameter padding out of the hot path (once per parameter set).
    w_pad, b_pad = prepare_nsp_params(weight, bias)

    out = jax.block_until_ready(
        next_sentence_prediction(pooled_output, w_pad, b_pad))
    ref = pooled_output @ weight.T + bias
    assert out.shape == (batch, 2)
    assert jnp.allclose(out, ref, atol=1e-5, rtol=1e-5)

    # Un-aligned, multi-tile batch (exercises padding + >=2 parallel grid steps).
    big_batch = 300
    big_x = jax.random.normal(jax.random.PRNGKey(1), (big_batch, hidden_size),
                              dtype=jnp.float32)
    out_big = jax.block_until_ready(
        next_sentence_prediction(big_x, w_pad, b_pad, tile_b=128))
    ref_big = big_x @ weight.T + bias
    assert out_big.shape == (big_batch, 2)
    assert jnp.allclose(out_big, ref_big, atol=1e-5, rtol=1e-5)

    print("KERNEL_OK")
</pallas_src>

<mosaic_0001>
module attributes {stable_mosaic.version = 11 : i64} {
  func.func @nsp_linear_kernel(%arg0: i32, %arg1: memref<128x32xf32, #tpu.memory_space<vmem>>, %arg2: memref<8x32xf32, #tpu.memory_space<vmem>>, %arg3: memref<8x1xf32, #tpu.memory_space<vmem>>, %arg4: memref<8x128xf32, #tpu.memory_space<vmem>>) attributes {dimension_semantics = [#tpu.dimension_semantics<parallel>], iteration_bounds = array<i64: 1>, scalar_prefetch = 0 : i64, scratch_operands = 0 : i64, tpu.core_type = #tpu.core_type<tc>, window_params = [{transform_indices = @transform_0, window_bounds = array<i64: 128, 32>}, {pipeline_mode = #tpu.pipeline_mode<synchronous>, transform_indices = @transform_1, window_bounds = array<i64: 8, 32>}, {pipeline_mode = #tpu.pipeline_mode<synchronous>, transform_indices = @transform_2, window_bounds = array<i64: 8, 1>}, {transform_indices = @transform_3, window_bounds = array<i64: 8, 128>}]} {
    %c0 = arith.constant 0 : index
    %c0_0 = arith.constant 0 : index
    %0 = vector.load %arg2[%c0, %c0_0] : memref<8x32xf32, #tpu.memory_space<vmem>>, vector<8x32xf32>
    %c0_1 = arith.constant 0 : index
    %c0_2 = arith.constant 0 : index
    %1 = vector.load %arg1[%c0_1, %c0_2] : memref<128x32xf32, #tpu.memory_space<vmem>>, vector<128x32xf32>
    %cst = arith.constant dense<0.000000e+00> : vector<8x128xf32>
    %2 = tpu.matmul %0, %1, %cst {dimension_numbers = #tpu.dot_dimension_numbers<[1], [1], [0], [0], [0, 0, 1, 0], [], []>} : vector<8x32xf32>, vector<128x32xf32>, vector<8x128xf32> -> vector<8x128xf32>
    %c0_3 = arith.constant 0 : index
    %c0_4 = arith.constant 0 : index
    %3 = vector.load %arg3[%c0_3, %c0_4] : memref<8x1xf32, #tpu.memory_space<vmem>>, vector<8x1xf32>
    %4 = vector.broadcast %3 : vector<8x1xf32> to vector<8x128xf32>
    %5 = arith.addf %2, %4 : vector<8x128xf32>
    %c0_5 = arith.constant 0 : index
    %c0_6 = arith.constant 0 : index
    %6 = vector.load %arg4[%c0_5, %c0_6] : memref<8x128xf32, #tpu.memory_space<vmem>>, vector<8x128xf32>
    tpu.vector_store %arg4[%c0_5, %c0_6], %5 {strides = array<i32>} : memref<8x128xf32, #tpu.memory_space<vmem>>, vector<8x128xf32>,
    return
  }
  func.func @transform_0(%arg0: i32) -> (i32, i32) {
    %c0_i32 = arith.constant 0 : i32
    %c0_i32_0 = arith.constant 0 : i32
    return %arg0, %c0_i32 : i32, i32
  }
  func.func @transform_1(%arg0: i32) -> (i32, i32) {
    %c0_i32 = arith.constant 0 : i32
    %c0_i32_0 = arith.constant 0 : i32
    %c0_i32_1 = arith.constant 0 : i32
    return %c0_i32, %c0_i32_0 : i32, i32
  }
  func.func @transform_2(%arg0: i32) -> (i32, i32) {
    %c0_i32 = arith.constant 0 : i32
    %c0_i32_0 = arith.constant 0 : i32
    %c0_i32_1 = arith.constant 0 : i32
    return %c0_i32, %c0_i32_0 : i32, i32
  }
  func.func @transform_3(%arg0: i32) -> (i32, i32) {
    %c0_i32 = arith.constant 0 : i32
    %c0_i32_0 = arith.constant 0 : i32
    return %c0_i32, %arg0 : i32, i32
  }
}

</mosaic_0001>

<bundles_post_ra>
// kernel: tpu_custom_call.1
= control target key start
LH: loop header
LB: loop body
LE: loop exit
PB: predicated region body
PF: predicated region fallthrough
CT: control target
= control target key end

     0   :  { %vm38_vm0 = vcmask 261120   ;;  %v271_v1 = vmov 0.0   ;;  %vm272_vm1 = vmmov 0   ;;  %v273_v2 = vmov 0   ;;  %s369_s0 = inlined_call_operand.vmem [shape: f32[128,32], index: 0, kind: input, shape index: {}]   ;;  %s370_s1 = inlined_call_operand.vmem [shape: f32[8,32], index: 1, kind: input, shape index: {}]   ;;  %s371_s2 = inlined_call_operand.vmem [shape: f32[8,1], index: 2, kind: input, shape index: {}]   ;;  %s372_s3 = inlined_call_operand.hbm [shape: f32[8,128], index: 3, kind: output, shape index: {}]  }
   0x1   :  { %v31_v0 = vld [vmem:[%s369_s0 + $0x78] sm:$0xff]  ;;  %209 = vmatprep.subr.mxu0 %v271_v1  ;;  %241 = vmatprep.mubr.msk.f32.mxu0 %vm272_vm1, %v271_v1  ;;  %v30_v3 = vld [vmem:[%s369_s0 + $0x70] sm:$0xff]  ;;  %v32_v4 = vld [vmem:[%s371_s2] sm:$0xff] }
   0x2   :  { %210 = vmatpush3.xpose.msk.msra.mxu0 %vm38_vm0, %v31_v0  ;;  %248 = vset.pattern.permute.xlu0 %v273_v2 }
   0x3   :  { %211 = vmatprep.subr.mxu0 %v271_v1  ;;  %35 = vperm.xlu0 %248, %v32_v4  }
   0x6   :  { %212 = vmatpush3.xpose.msk.msra.mxu0 %vm38_vm0, %v30_v3 }
   0x7   :  { %8 = vsyncpa [#allocation3], 0  ;;  %213 = vmatprep.subr.mxu0 %v271_v1  ;;  %v29_v5 = vld [vmem:[%s369_s0 + $0x68] sm:$0xff]  ;;  %v28_v6 = vld [vmem:[%s369_s0 + $0x60] sm:$0xff]  ;;  %s274_s20 = smov [#allocation2]  }
   0x8   :  { %v27_v7 = vld [vmem:[%s369_s0 + $0x58] sm:$0xff]  ;;  %v26_v8 = vld [vmem:[%s369_s0 + $0x50] sm:$0xff]  ;;  %v25_v9 = vld [vmem:[%s369_s0 + $0x48] sm:$0xff]  ;;  %s167_s21 = sshll.u32 %s274_s20, 4  ;;  %s168_s21 = int_to_ptr.vmem [resolvable:$true] %s167_s21 }
   0x9   :  { %v24_v10 = vld [vmem:[%s369_s0 + $0x40] sm:$0xff]  ;;  %v23_v11 = vld [vmem:[%s369_s0 + $0x38] sm:$0xff]  ;;  %v22_v12 = vld [vmem:[%s369_s0 + $0x30] sm:$0xff]  ;;  %s249_s2 = scalar_lea.vmem %s168_s21, 128  ;;  %p254_p1 = scmp.lt.s32.totalorder %s168_s21, %s168_s21 }
   0xa   :  { %214 = vmatpush3.xpose.msk.msra.mxu0 %vm38_vm0, %v29_v5  ;;  %v21_v13 = vld [vmem:[%s369_s0 + $0x28] sm:$0xff]  ;;  %v20_v14 = vld [vmem:[%s369_s0 + $0x20] sm:$0xff]  ;;  %v19_v15 = vld [vmem:[%s369_s0 + $0x18] sm:$0xff]  ;;  %p250_p0 = scmp.ne.s32.totalorder %s168_s21, %s249_s2  ;;  %p255_p2 = scmp.lt.s32.totalorder %s249_s2, %s249_s2 }
   0xb   :  { %215 = vmatprep.subr.mxu0 %v271_v1  ;;  %v18_v16 = vld [vmem:[%s369_s0 + $0x10] sm:$0xff]  ;;  %v17_v17 = vld [vmem:[%s369_s0 + $0x8] sm:$0xff]  ;;  %v16_v18 = vld [vmem:[%s369_s0] sm:$0xff] }
   0xc   :  { %v15_v19 = vld [vmem:[%s370_s1] sm:$0xff]  ;;  %p256_p3 = por %p255_p2, %p254_p1 }
   0xe   :  { %216 = vmatpush3.xpose.msk.msra.mxu0 %vm38_vm0, %v28_v6  ;;  %p257_p4 = pnand %p256_p3, %p250_p0 }
   0xf   :  { %217 = vmatprep.subr.mxu0 %v271_v1 }
  0x12   :  { %218 = vmatpush3.xpose.msk.msra.mxu0 %vm38_vm0, %v27_v7 }
  0x13   :  { %219 = vmatprep.subr.mxu0 %v271_v1 }
  0x16   :  { %220 = vmatpush3.xpose.msk.msra.mxu0 %vm38_vm0, %v26_v8 }
  0x17   :  { %221 = vmatprep.subr.mxu0 %v271_v1 }
  0x1a   :  { %222 = vmatpush3.xpose.msk.msra.mxu0 %vm38_vm0, %v25_v9 }
  0x1b   :  { %223 = vmatprep.subr.mxu0 %v271_v1 }
  0x1e   :  { %224 = vmatpush3.xpose.msk.msra.mxu0 %vm38_vm0, %v24_v10 }
  0x1f   :  { %225 = vmatprep.subr.mxu0 %v271_v1 }
  0x22   :  { %226 = vmatpush3.xpose.msk.msra.mxu0 %vm38_vm0, %v23_v11 }
  0x23   :  { %227 = vmatprep.subr.mxu0 %v271_v1 }
  0x26   :  { %228 = vmatpush3.xpose.msk.msra.mxu0 %vm38_vm0, %v22_v12 }
  0x27   :  { %229 = vmatprep.subr.mxu0 %v271_v1 }
  0x2a   :  { %230 = vmatpush3.xpose.msk.msra.mxu0 %vm38_vm0, %v21_v13 }
  0x2b   :  { %231 = vmatprep.subr.mxu0 %v271_v1 }
  0x2e   :  { %232 = vmatpush3.xpose.msk.msra.mxu0 %vm38_vm0, %v20_v14 }
  0x2f   :  { %233 = vmatprep.subr.mxu0 %v271_v1 }
  0x32   :  { %234 = vmatpush3.xpose.msk.msra.mxu0 %vm38_vm0, %v19_v15 }
  0x33   :  { %235 = vmatprep.subr.mxu0 %v271_v1 }
  0x36   :  { %236 = vmatpush3.xpose.msk.msra.mxu0 %vm38_vm0, %v18_v16 }
  0x37   :  { %237 = vmatprep.subr.mxu0 %v271_v1 }
  0x3a   :  { %238 = vmatpush3.xpose.msk.msra.mxu0 %vm38_vm0, %v17_v17 }
  0x3b   :  { %239 = vmatprep.subr.mxu0 %v271_v1 }
  0x3e   :  { %240 = vmatpush3.xpose.msk.msra.mxu0 %vm38_vm0, %v16_v18 }
  0x41   :  { %242 = vmatmul.mubr.msk.f32.vlgmr.msra.gmra.mxu0 %vm38_vm0, %v15_v19 }
  0x7e   :  { %v36_v20 = vpop.permute.xlu0 %35 }
 0x101   :  { %v156_v21 = vpop.f32.mrf.mxu0 }
 0x102   :  { %v157_v22 = vadd.f32 %v156_v21, %v36_v20 }
 0x103   :  { %v243_v23 = vpop.f32.mrf.mxu0 }
 0x104   :  { %160 = vst [vmem:[#allocation2] sm:$0xff] %v157_v22 }
 0x105   :  { %260 = shalt.err (!%p257_p4)
}
 0x106   :  { %170 = dma.vmem_to_hbm [thread:$0]  %s168_s21, 128, %s372_s3, [#allocation3]  }
 0x107   :  { %269 = dma.done.wait [#allocation3], 128  }
 0x108   :  { %270 = vsyncadd [#allocation3], 4294967168 }
 0x109   :  { %174 = vsyncpa [#allocation3], 1 }

</bundles_post_ra>
